<compile_context>
chip_gen: v7x
topology: tpu7x:2x2x1
jax: 0.10.0
libtpu: 0.0.40
codegen_flags: <defaults>
</compile_context>

<pallas_src>
import jax
import jax.numpy as jnp
from jax.experimental import pallas as pl
from jax.experimental.pallas import tpu as pltpu


def _mhsa_kernel(q_ref, kT_ref, v_ref, wo_ref, bo_ref, o_ref,
                 m_s, l_s, acc_s, oacc_s):
    h = pl.program_id(2)
    kv = pl.program_id(3)
    last_h = pl.num_programs(2) - 1
    last_kv = pl.num_programs(3) - 1

    # New (b, q-tile) cycle: seed the output-projection accumulator with the bias.
    @pl.when((h == 0) & (kv == 0))
    def _():
        oacc_s[...] = jnp.broadcast_to(bo_ref[...], oacc_s.shape)

    # New head: reset the online-softmax state.
    @pl.when(kv == 0)
    def _():
        m_s[...] = jnp.full_like(m_s, -jnp.inf)
        l_s[...] = jnp.zeros_like(l_s)
        acc_s[...] = jnp.zeros_like(acc_s)

    # Scores for this (q-tile, kv-tile): (tq, tkv) f32.
    # Q is pre-scaled by 1/sqrt(K); K is pre-transposed to (S, tkv) -> natural layout,
    # no per-step XLU transpose.
    s = jnp.dot(q_ref[...], kT_ref[...], preferred_element_type=jnp.float32)

    # Online softmax update (f32 statistics; f32 exp for v5e portability).
    m_prev = m_s[...]
    m_new = jnp.maximum(m_prev, jnp.max(s, axis=-1, keepdims=True))
    alpha = jnp.exp(m_prev - m_new)
    p = jnp.exp(s - m_new)
    l_s[...] = alpha * l_s[...] + jnp.sum(p, axis=-1, keepdims=True)
    acc_s[...] = alpha * acc_s[...] + jnp.dot(p.astype(jnp.bfloat16), v_ref[...],
                                              preferred_element_type=jnp.float32)
    m_s[...] = m_new

    # End of this head: normalise and fold into the output-projection accumulator.
    # wo_ref is fully resident (H, S, K); dynamic leading-dim index is cheap.
    @pl.when(kv == last_kv)
    def _():
        out_h = acc_s[...] * pl.reciprocal(l_s[...], approx=True)       # (tq, S) f32
        oacc_s[...] += jnp.dot(out_h.astype(jnp.bfloat16), wo_ref[h],
                               preferred_element_type=jnp.float32)

    # End of the whole (h, kv) cycle: emit one lane-dense (tq, K) tile.
    @pl.when((h == last_h) & (kv == last_kv))
    def _():
        o_ref[...] = oacc_s[...].astype(o_ref.dtype)


def _pick_tile(total, tile, align):
    """Largest tile <= `tile` that divides `total` and is either `align`-aligned or the
    full extent (satisfies the (8,128) block constraints); never silently invalid."""
    tile = min(tile, total)
    for cand in range(tile, 0, -1):
        if total % cand == 0 and (cand % align == 0 or cand == total):
            return cand
    return total


def self_attention_pallas(x, wq, wk, wv, wo, bo, *, heads, tq=256, tkv=512):
    """x: (B, T, K) f32.  wq/wk/wv/wo: (K, K) torch-Linear weights (out, in).  bo: (K,)."""
    B, T, K = x.shape
    assert K % heads == 0, "Embedding size must be divisible by number of heads"
    H = heads
    S = K // H
    scale = 1.0 / float(K) ** 0.5        # reference scales by sqrt(k) (full embedding dim)

    tq = _pick_tile(T, tq, 8)            # q-tile: sublane dim of blocks -> multiple of 8
    tkv = _pick_tile(T, tkv, 128)        # kv-tile: lane dim of the K^T block -> multiple of 128
    nq = T // tq
    nkv = T // tkv

    bf = jnp.bfloat16
    xb = x.astype(bf)

    # Pre-project Q/K/V once per batch with full-width (K,K) bf16 matmuls (MXU-friendly
    # in XLA), fold the 1/sqrt(K) scale into Q, split heads, pre-transpose K.
    q = jnp.dot(xb, wq.T.astype(bf), preferred_element_type=jnp.float32) * scale
    k = jnp.dot(xb, wk.T.astype(bf), preferred_element_type=jnp.float32)
    v = jnp.dot(xb, wv.T.astype(bf), preferred_element_type=jnp.float32)
    q = q.reshape(B, T, H, S).transpose(0, 2, 1, 3).astype(bf)     # (B, H, T, S)
    kT = k.reshape(B, T, H, S).transpose(0, 2, 3, 1).astype(bf)    # (B, H, S, T)
    v = v.reshape(B, T, H, S).transpose(0, 2, 1, 3).astype(bf)     # (B, H, T, S)

    # Output projection weight, per-head slices of Wo^T, resident in VMEM.
    wo_h = wo.T.reshape(H, S, K).astype(bf)                        # (H, S, K)
    bo_2d = bo.reshape(1, K).astype(jnp.float32)

    return pl.pallas_call(
        _mhsa_kernel,
        out_shape=jax.ShapeDtypeStruct((B, T, K), jnp.float32),
        grid=(B, nq, H, nkv),
        in_specs=[
            pl.BlockSpec((None, None, tq, S), lambda b, qi, h, kv: (b, h, qi, 0)),   # Q tile
            pl.BlockSpec((None, None, S, tkv), lambda b, qi, h, kv: (b, h, 0, kv)),  # K^T tile
            pl.BlockSpec((None, None, tkv, S), lambda b, qi, h, kv: (b, h, kv, 0)),  # V tile
            pl.BlockSpec((H, S, K), lambda b, qi, h, kv: (0, 0, 0)),                 # Wo (resident)
            pl.BlockSpec((1, K), lambda b, qi, h, kv: (0, 0)),                       # bias (resident)
        ],
        out_specs=pl.BlockSpec((None, tq, K), lambda b, qi, h, kv: (b, qi, 0)),
        scratch_shapes=[
            pltpu.VMEM((tq, 1), jnp.float32),     # m_s   : running max
            pltpu.VMEM((tq, 1), jnp.float32),     # l_s   : running denominator
            pltpu.VMEM((tq, S), jnp.float32),     # acc_s : running numerator
            pltpu.VMEM((tq, K), jnp.float32),     # oacc_s: output-projection accumulator
        ],
        compiler_params=pltpu.CompilerParams(
            dimension_semantics=("parallel", "parallel", "arbitrary", "arbitrary"),
            vmem_limit_bytes=48 * 1024 * 1024),
    )(q, kT, v, wo_h, bo_2d)


def self_attention_ref(x, wq, wk, wv, wo, bo, *, heads):
    """Pure-JAX reference mirroring the kernel numerics (bf16 operands, f32 accumulate)."""
    B, T, K = x.shape
    H, S = heads, K // heads
    bf = jnp.bfloat16
    xb = x.astype(bf)
    q = jnp.dot(xb, wq.T.astype(bf), preferred_element_type=jnp.float32) / jnp.sqrt(jnp.float32(K))
    k = jnp.dot(xb, wk.T.astype(bf), preferred_element_type=jnp.float32)
    v = jnp.dot(xb, wv.T.astype(bf), preferred_element_type=jnp.float32)
    q = q.reshape(B, T, H, S).transpose(0, 2, 1, 3)
    k = k.reshape(B, T, H, S).transpose(0, 2, 1, 3)
    v = v.reshape(B, T, H, S).transpose(0, 2, 1, 3)
    dot = jnp.einsum('bhtd,bhkd->bhtk', q.astype(bf), k.astype(bf),
                     preferred_element_type=jnp.float32)
    p = jax.nn.softmax(dot, axis=-1)
    out = jnp.einsum('bhtk,bhkd->bhtd', p.astype(bf), v.astype(bf),
                     preferred_element_type=jnp.float32)
    out = out.transpose(0, 2, 1, 3).reshape(B, T, K)
    return jnp.dot(out.astype(bf), wo.T.astype(bf),
                   preferred_element_type=jnp.float32) + bo


if __name__ == "__main__":
    B, T, K, HEADS = 2, 256, 128, 4

    key = jax.random.PRNGKey(0)
    kx, k1, k2, k3, k4, k5 = jax.random.split(key, 6)

    # torch nn.Linear default init: U(-1/sqrt(in), 1/sqrt(in)).
    bound = 1.0 / jnp.sqrt(jnp.float32(K))
    wq = jax.random.uniform(k1, (K, K), jnp.float32, -bound, bound)
    wk = jax.random.uniform(k2, (K, K), jnp.float32, -bound, bound)
    wv = jax.random.uniform(k3, (K, K), jnp.float32, -bound, bound)
    wo = jax.random.uniform(k4, (K, K), jnp.float32, -bound, bound)
    bo = jax.random.uniform(k5, (K,), jnp.float32, -bound, bound)

    x = jax.random.normal(kx, (B, T, K), jnp.float32)

    # Small tiles so the demo exercises multiple q tiles (nq=4), kv tiles (nkv=2) and
    # heads (H=4); production defaults are tq=256 / tkv=512.
    out = self_attention_pallas(x, wq, wk, wv, wo, bo, heads=HEADS, tq=64, tkv=128)
    out = jax.block_until_ready(out)

    ref = self_attention_ref(x, wq, wk, wv, wo, bo, heads=HEADS)
    assert out.shape == (B, T, K)
    max_err = float(jnp.max(jnp.abs(out - ref)))
    assert jnp.allclose(out, ref, atol=1e-2, rtol=1e-2), \
        f"mismatch vs reference (max abs err {max_err})"

    print("KERNEL_OK")
</pallas_src>

<mosaic_0001>
module attributes {stable_mosaic.version = 11 : i64} {
  func.func @_mhsa_kernel(%arg0: i32, %arg1: i32, %arg2: i32, %arg3: i32, %arg4: memref<1x1x64x32xbf16, #tpu.memory_space<vmem>>, %arg5: memref<1x1x32x128xbf16, #tpu.memory_space<vmem>>, %arg6: memref<1x1x128x32xbf16, #tpu.memory_space<vmem>>, %arg7: memref<4x32x128xbf16, #tpu.memory_space<vmem>>, %arg8: memref<1x128xf32, #tpu.memory_space<vmem>>, %arg9: memref<1x64x128xf32, #tpu.memory_space<vmem>>, %arg10: memref<64x1xf32, #tpu.memory_space<vmem>>, %arg11: memref<64x1xf32, #tpu.memory_space<vmem>>, %arg12: memref<64x32xf32, #tpu.memory_space<vmem>>, %arg13: memref<64x128xf32, #tpu.memory_space<vmem>>) attributes {dimension_semantics = [#tpu.dimension_semantics<parallel>, #tpu.dimension_semantics<parallel>, #tpu.dimension_semantics<arbitrary>, #tpu.dimension_semantics<arbitrary>], iteration_bounds = array<i64: 2, 4, 4, 2>, scalar_prefetch = 0 : i64, scratch_operands = 4 : i64, tpu.core_type = #tpu.core_type<tc>, window_params = [{transform_indices = @transform_0, window_bounds = array<i64: 1, 1, 64, 32>}, {transform_indices = @transform_1, window_bounds = array<i64: 1, 1, 32, 128>}, {transform_indices = @transform_2, window_bounds = array<i64: 1, 1, 128, 32>}, {pipeline_mode = #tpu.pipeline_mode<synchronous>, transform_indices = @transform_3, window_bounds = array<i64: 4, 32, 128>}, {pipeline_mode = #tpu.pipeline_mode<synchronous>, transform_indices = @transform_4, window_bounds = array<i64: 1, 128>}, {transform_indices = @transform_5, window_bounds = array<i64: 1, 64, 128>}]} {
    %c0_i32 = arith.constant 0 : i32
    %0 = arith.cmpi eq, %arg2, %c0_i32 : i32
    %c0_i32_0 = arith.constant 0 : i32
    %1 = arith.cmpi eq, %arg3, %c0_i32_0 : i32
    %2 = arith.andi %0, %1 : i1
    %3 = arith.extui %2 : i1 to i32
    %c0_i32_1 = arith.constant 0 : i32
    %4 = arith.cmpi ne, %3, %c0_i32_1 : i32
    scf.if %4 {
      %c0_33 = arith.constant 0 : index
      %c0_34 = arith.constant 0 : index
      %46 = vector.load %arg8[%c0_33, %c0_34] : memref<1x128xf32, #tpu.memory_space<vmem>>, vector<1x128xf32>
      %47 = vector.shape_cast %46 : vector<1x128xf32> to vector<1x128xf32>
      %48 = vector.broadcast %47 : vector<1x128xf32> to vector<64x128xf32>
      %c0_35 = arith.constant 0 : index
      %c0_36 = arith.constant 0 : index
      %49 = vector.load %arg13[%c0_35, %c0_36] : memref<64x128xf32, #tpu.memory_space<vmem>>, vector<64x128xf32>
      tpu.vector_store %arg13[%c0_35, %c0_36], %48 {strides = array<i32>} : memref<64x128xf32, #tpu.memory_space<vmem>>, vector<64x128xf32>,
    } else {
    }
    %c0_i32_2 = arith.constant 0 : i32
    %5 = arith.cmpi eq, %arg3, %c0_i32_2 : i32
    %6 = arith.extui %5 : i1 to i32
    %c0_i32_3 = arith.constant 0 : i32
    %7 = arith.cmpi ne, %6, %c0_i32_3 : i32
    scf.if %7 {
      %cst_33 = arith.constant 0xFF800000 : f32
      %46 = vector.broadcast %cst_33 : f32 to vector<64x1xf32>
      %c0_34 = arith.constant 0 : index
      %c0_35 = arith.constant 0 : index
      %47 = vector.load %arg10[%c0_34, %c0_35] : memref<64x1xf32, #tpu.memory_space<vmem>>, vector<64x1xf32>
      tpu.vector_store %arg10[%c0_34, %c0_35], %46 {strides = array<i32>} : memref<64x1xf32, #tpu.memory_space<vmem>>, vector<64x1xf32>,
      %cst_36 = arith.constant 0.000000e+00 : f32
      %48 = vector.broadcast %cst_36 : f32 to vector<64x1xf32>
      %c0_37 = arith.constant 0 : index
      %c0_38 = arith.constant 0 : index
      %49 = vector.load %arg11[%c0_37, %c0_38] : memref<64x1xf32, #tpu.memory_space<vmem>>, vector<64x1xf32>
      tpu.vector_store %arg11[%c0_37, %c0_38], %48 {strides = array<i32>} : memref<64x1xf32, #tpu.memory_space<vmem>>, vector<64x1xf32>,
      %cst_39 = arith.constant 0.000000e+00 : f32
      %50 = vector.broadcast %cst_39 : f32 to vector<64x32xf32>
      %c0_40 = arith.constant 0 : index
      %c0_41 = arith.constant 0 : index
      %51 = vector.load %arg12[%c0_40, %c0_41] : memref<64x32xf32, #tpu.memory_space<vmem>>, vector<64x32xf32>
      tpu.vector_store %arg12[%c0_40, %c0_41], %50 {strides = array<i32>} : memref<64x32xf32, #tpu.memory_space<vmem>>, vector<64x32xf32>,
    } else {
    }
    %c0 = arith.constant 0 : index
    %c0_4 = arith.constant 0 : index
    %c0_5 = arith.constant 0 : index
    %c0_6 = arith.constant 0 : index
    %8 = vector.load %arg4[%c0, %c0_4, %c0_5, %c0_6] : memref<1x1x64x32xbf16, #tpu.memory_space<vmem>>, vector<1x1x64x32xbf16>
    %9 = vector.shape_cast %8 : vector<1x1x64x32xbf16> to vector<64x32xbf16>
    %c0_7 = arith.constant 0 : index
    %c0_8 = arith.constant 0 : index
    %c0_9 = arith.constant 0 : index
    %c0_10 = arith.constant 0 : index
    %10 = vector.load %arg5[%c0_7, %c0_8, %c0_9, %c0_10] : memref<1x1x32x128xbf16, #tpu.memory_space<vmem>>, vector<1x1x32x128xbf16>
    %11 = vector.shape_cast %10 : vector<1x1x32x128xbf16> to vector<32x128xbf16>
    %cst = arith.constant dense<0.000000e+00> : vector<64x128xf32>
    %12 = tpu.matmul %9, %11, %cst {dimension_numbers = #tpu.dot_dimension_numbers<[1], [0], [0], [1], [0, 0, 1, 1], [], []>} : vector<64x32xbf16>, vector<32x128xbf16>, vector<64x128xf32> -> vector<64x128xf32>
    %c0_11 = arith.constant 0 : index
    %c0_12 = arith.constant 0 : index
    %13 = vector.load %arg10[%c0_11, %c0_12] : memref<64x1xf32, #tpu.memory_space<vmem>>, vector<64x1xf32>
    %cst_13 = arith.constant dense<0xFF800000> : vector<64xf32>
    %14 = vector.multi_reduction <maximumf>, %12, %cst_13 [1] : vector<64x128xf32> to vector<64xf32>
    %15 = vector.shape_cast %14 : vector<64xf32> to vector<64x1xf32>
    %16 = arith.maximumf %13, %15 : vector<64x1xf32>
    %17 = arith.subf %13, %16 : vector<64x1xf32>
    %18 = math.exp %17 : vector<64x1xf32>
    %19 = vector.broadcast %16 : vector<64x1xf32> to vector<64x128xf32>
    %20 = arith.subf %12, %19 : vector<64x128xf32>
    %21 = math.exp %20 : vector<64x128xf32>
    %c0_14 = arith.constant 0 : index
    %c0_15 = arith.constant 0 : index
    %22 = vector.load %arg11[%c0_14, %c0_15] : memref<64x1xf32, #tpu.memory_space<vmem>>, vector<64x1xf32>
    %23 = arith.mulf %18, %22 : vector<64x1xf32>
    %cst_16 = arith.constant dense<0.000000e+00> : vector<64xf32>
    %24 = vector.multi_reduction <add>, %21, %cst_16 [1] : vector<64x128xf32> to vector<64xf32>
    %25 = vector.shape_cast %24 : vector<64xf32> to vector<64x1xf32>
    %26 = arith.addf %23, %25 : vector<64x1xf32>
    %c0_17 = arith.constant 0 : index
    %c0_18 = arith.constant 0 : index
    %27 = vector.load %arg11[%c0_17, %c0_18] : memref<64x1xf32, #tpu.memory_space<vmem>>, vector<64x1xf32>
    tpu.vector_store %arg11[%c0_17, %c0_18], %26 {strides = array<i32>} : memref<64x1xf32, #tpu.memory_space<vmem>>, vector<64x1xf32>,
    %c0_19 = arith.constant 0 : index
    %c0_20 = arith.constant 0 : index
    %28 = vector.load %arg12[%c0_19, %c0_20] : memref<64x32xf32, #tpu.memory_space<vmem>>, vector<64x32xf32>
    %29 = vector.broadcast %18 : vector<64x1xf32> to vector<64x32xf32>
    %30 = arith.mulf %29, %28 : vector<64x32xf32>
    %31 = arith.truncf %21 : vector<64x128xf32> to vector<64x128xbf16>
    %c0_21 = arith.constant 0 : index
    %c0_22 = arith.constant 0 : index
    %c0_23 = arith.constant 0 : index
    %c0_24 = arith.constant 0 : index
    %32 = vector.load %arg6[%c0_21, %c0_22, %c0_23, %c0_24] : memref<1x1x128x32xbf16, #tpu.memory_space<vmem>>, vector<1x1x128x32xbf16>
    %33 = vector.shape_cast %32 : vector<1x1x128x32xbf16> to vector<128x32xbf16>
    %cst_25 = arith.constant dense<0.000000e+00> : vector<64x32xf32>
    %34 = tpu.matmul %31, %33, %cst_25 {dimension_numbers = #tpu.dot_dimension_numbers<[1], [0], [0], [1], [0, 0, 1, 1], [], []>} : vector<64x128xbf16>, vector<128x32xbf16>, vector<64x32xf32> -> vector<64x32xf32>
    %35 = arith.addf %30, %34 : vector<64x32xf32>
    %c0_26 = arith.constant 0 : index
    %c0_27 = arith.constant 0 : index
    %36 = vector.load %arg12[%c0_26, %c0_27] : memref<64x32xf32, #tpu.memory_space<vmem>>, vector<64x32xf32>
    tpu.vector_store %arg12[%c0_26, %c0_27], %35 {strides = array<i32>} : memref<64x32xf32, #tpu.memory_space<vmem>>, vector<64x32xf32>,
    %c0_28 = arith.constant 0 : index
    %c0_29 = arith.constant 0 : index
    %37 = vector.load %arg10[%c0_28, %c0_29] : memref<64x1xf32, #tpu.memory_space<vmem>>, vector<64x1xf32>
    tpu.vector_store %arg10[%c0_28, %c0_29], %16 {strides = array<i32>} : memref<64x1xf32, #tpu.memory_space<vmem>>, vector<64x1xf32>,
    %c1_i32 = arith.constant 1 : i32
    %38 = arith.cmpi eq, %arg3, %c1_i32 : i32
    %39 = arith.extui %38 : i1 to i32
    %c0_i32_30 = arith.constant 0 : i32
    %40 = arith.cmpi ne, %39, %c0_i32_30 : i32
    scf.if %40 {
      %c0_33 = arith.constant 0 : index
      %c0_34 = arith.constant 0 : index
      %46 = vector.load %arg12[%c0_33, %c0_34] : memref<64x32xf32, #tpu.memory_space<vmem>>, vector<64x32xf32>
      %c0_35 = arith.constant 0 : index
      %c0_36 = arith.constant 0 : index
      %47 = vector.load %arg11[%c0_35, %c0_36] : memref<64x1xf32, #tpu.memory_space<vmem>>, vector<64x1xf32>
      %48 = tpu.reciprocal %47 {approx = true} : vector<64x1xf32> -> vector<64x1xf32>
      %49 = vector.broadcast %48 : vector<64x1xf32> to vector<64x32xf32>
      %50 = arith.mulf %46, %49 : vector<64x32xf32>
      %c0_37 = arith.constant 0 : index
      %c0_38 = arith.constant 0 : index
      %51 = vector.load %arg13[%c0_37, %c0_38] : memref<64x128xf32, #tpu.memory_space<vmem>>, vector<64x128xf32>
      %52 = arith.truncf %50 : vector<64x32xf32> to vector<64x32xbf16>
      %53 = arith.index_cast %arg2 : i32 to index
      %c0_39 = arith.constant 0 : index
      %c0_40 = arith.constant 0 : index
      %54 = vector.load %arg7[%53, %c0_39, %c0_40] : memref<4x32x128xbf16, #tpu.memory_space<vmem>>, vector<1x32x128xbf16>
      %55 = vector.shape_cast %54 : vector<1x32x128xbf16> to vector<32x128xbf16>
      %cst_41 = arith.constant dense<0.000000e+00> : vector<64x128xf32>
      %56 = tpu.matmul %52, %55, %cst_41 {dimension_numbers = #tpu.dot_dimension_numbers<[1], [0], [0], [1], [0, 0, 1, 1], [], []>} : vector<64x32xbf16>, vector<32x128xbf16>, vector<64x128xf32> -> vector<64x128xf32>
      %57 = arith.addf %51, %56 : vector<64x128xf32>
      %c0_42 = arith.constant 0 : index
      %c0_43 = arith.constant 0 : index
      %58 = vector.load %arg13[%c0_42, %c0_43] : memref<64x128xf32, #tpu.memory_space<vmem>>, vector<64x128xf32>
      tpu.vector_store %arg13[%c0_42, %c0_43], %57 {strides = array<i32>} : memref<64x128xf32, #tpu.memory_space<vmem>>, vector<64x128xf32>,
    } else {
    }
    %c3_i32 = arith.constant 3 : i32
    %41 = arith.cmpi eq, %arg2, %c3_i32 : i32
    %c1_i32_31 = arith.constant 1 : i32
    %42 = arith.cmpi eq, %arg3, %c1_i32_31 : i32
    %43 = arith.andi %41, %42 : i1
    %44 = arith.extui %43 : i1 to i32
    %c0_i32_32 = arith.constant 0 : i32
    %45 = arith.cmpi ne, %44, %c0_i32_32 : i32
    scf.if %45 {
      %c0_33 = arith.constant 0 : index
      %c0_34 = arith.constant 0 : index
      %46 = vector.load %arg13[%c0_33, %c0_34] : memref<64x128xf32, #tpu.memory_space<vmem>>, vector<64x128xf32>
      %c0_35 = arith.constant 0 : index
      %c0_36 = arith.constant 0 : index
      %c0_37 = arith.constant 0 : index
      %47 = vector.load %arg9[%c0_35, %c0_36, %c0_37] : memref<1x64x128xf32, #tpu.memory_space<vmem>>, vector<1x64x128xf32>
      %48 = vector.shape_cast %47 : vector<1x64x128xf32> to vector<64x128xf32>
      %49 = vector.shape_cast %46 : vector<64x128xf32> to vector<1x64x128xf32>
      tpu.vector_store %arg9[%c0_35, %c0_36, %c0_37], %49 {strides = array<i32>} : memref<1x64x128xf32, #tpu.memory_space<vmem>>, vector<1x64x128xf32>,
    } else {
    }
    return
  }
  func.func @transform_0(%arg0: i32, %arg1: i32, %arg2: i32, %arg3: i32) -> (i32, i32, i32, i32) {
    %c0_i32 = arith.constant 0 : i32
    %c0_i32_0 = arith.constant 0 : i32
    return %arg0, %arg2, %arg1, %c0_i32 : i32, i32, i32, i32
  }
  func.func @transform_1(%arg0: i32, %arg1: i32, %arg2: i32, %arg3: i32) -> (i32, i32, i32, i32) {
    %c0_i32 = arith.constant 0 : i32
    %c0_i32_0 = arith.constant 0 : i32
    return %arg0, %arg2, %c0_i32, %arg3 : i32, i32, i32, i32
  }
  func.func @transform_2(%arg0: i32, %arg1: i32, %arg2: i32, %arg3: i32) -> (i32, i32, i32, i32) {
    %c0_i32 = arith.constant 0 : i32
    %c0_i32_0 = arith.constant 0 : i32
    return %arg0, %arg2, %arg3, %c0_i32 : i32, i32, i32, i32
  }
  func.func @transform_3(%arg0: i32, %arg1: i32, %arg2: i32, %arg3: i32) -> (i32, i32, i32) {
    %c0_i32 = arith.constant 0 : i32
    %c0_i32_0 = arith.constant 0 : i32
    %c0_i32_1 = arith.constant 0 : i32
    %c0_i32_2 = arith.constant 0 : i32
    return %c0_i32, %c0_i32_0, %c0_i32_1 : i32, i32, i32
  }
  func.func @transform_4(%arg0: i32, %arg1: i32, %arg2: i32, %arg3: i32) -> (i32, i32) {
    %c0_i32 = arith.constant 0 : i32
    %c0_i32_0 = arith.constant 0 : i32
    %c0_i32_1 = arith.constant 0 : i32
    return %c0_i32, %c0_i32_0 : i32, i32
  }
  func.func @transform_5(%arg0: i32, %arg1: i32, %arg2: i32, %arg3: i32) -> (i32, i32, i32) {
    %c0_i32 = arith.constant 0 : i32
    %c0_i32_0 = arith.constant 0 : i32
    return %arg0, %arg1, %c0_i32 : i32, i32, i32
  }
}

</mosaic_0001>

<bundles_post_ra>
// kernel: tpu_custom_call.1
= control target key start
LH: loop header
LB: loop body
LE: loop exit
PB: predicated region body
PF: predicated region fallthrough
CT: control target
= control target key end

     0   :  { %s2290_s0 = inlined_call_operand.vmem [shape: bf16[2,4,256,32], index: 0, kind: input, shape index: {}]   ;;  %s2291_s1 = inlined_call_operand.vmem [shape: bf16[2,4,32,256], index: 1, kind: input, shape index: {}]   ;;  %s2292_s2 = inlined_call_operand.vmem [shape: bf16[2,4,256,32], index: 2, kind: input, shape index: {}]   ;;  %s2293_s3 = inlined_call_operand.vmem [shape: bf16[4,32,128], index: 3, kind: input, shape index: {}]   ;;  %s2294_s4 = inlined_call_operand.vmem [shape: f32[1,128], index: 4, kind: input, shape index: {}]   ;;  %s2295_s5 = inlined_call_operand.hbm [shape: f32[2,256,128], index: 5, kind: output, shape index: {}]  }
   0x1   :  { %2309 = sst [smem:[#allocation21_spill]] %s2290_s0 }
   0x2   :  { %2310 = sst [smem:[#allocation22_spill]] %s2291_s1 }
   0x3   :  { %2311 = sst [smem:[#allocation23_spill]] %s2292_s2 }
   0x4   :  { %2312 = sst [smem:[#allocation24_spill]] %s2293_s3 }
   0x5   :  { %2313 = sst [smem:[#allocation25_spill]] %s2294_s4 }
   0x6   :  { %2314 = sst [smem:[#allocation26_spill]] %s2295_s5 }
   0x7   :  { %10 = vsyncpa [#allocation8], 0 }
   0x8   :  { %12 = vsyncpa [#allocation8 + $0x1], 0  ;;  %s1858_s18 = smov 0   ;;  %s1860_s19 = smov 0  }
   0x9   :  { %s1862_s20 = smov 0   ;;  %s1864_s21 = smov 0  }
   0xa   :  { %s1866_s22 = smov 0   ;;  %s1868_s23 = smov 0  }
   0xb   :  { %s1870_s24 = smov 0   ;;  %s1872_s25 = smov 0  }
   0xc   :  { %s1874_s26 = smov 0   ;;  %s1876_s27 = smov 0  }
   0xd   :  { %s1878_s28 = smov 0   ;;  %s1880_s29 = smov 0  }
   0xe   :  { %s1882_s30 = smov 0   ;;  %s1884_s6 = smov 0  }
   0xf LB: > { %2315 = sst [smem:[#allocation10_spill]] %s1767_s18  ;;  %s33_s7 = sadd.s32 1, %s1803_s27  ;;  %s1819_s6 = sphi %s1884_s6, %s18_s6   ;;  %s1815_s30 = sphi %s1882_s30, %s2347_s30   ;;  %s1811_s29 = sphi %s1880_s29, %s2346_s29   ;;  %s1807_s28 = sphi %s1878_s28, %s2345_s28   ;;  %s1803_s27 = sphi %s1876_s27, %s2344_s27   ;;  %s1799_s26 = sphi %s1874_s26, %s2343_s26   ;;  %s1795_s25 = sphi %s1872_s25, %s2342_s25   ;;  %s1791_s24 = sphi %s1870_s24, %s2341_s24   ;;  %s1787_s23 = sphi %s1868_s23, %s2353_s23   ;;  %s1783_s22 = sphi %s1866_s22, %s2352_s22   ;;  %s1779_s21 = sphi %s1864_s21, %s2351_s21   ;;  %s1775_s20 = sphi %s1862_s20, %s2350_s20   ;;  %s1771_s19 = sphi %s1860_s19, %s2349_s19   ;;  %s1767_s18 = sphi %s1858_s18, %s2348_s18  }
  0x10   : > { %2316 = sst [smem:[#allocation11_spill]] %s1803_s27  ;;  %p34_p0 = scmp.ge.s32.totalorder %s33_s7, 2 }
  0x11   : > { %2317 = sst [smem:[#allocation12_spill]] %s1807_s28  ;;  %s36_s8 = sadd.s32 1, %s1807_s28 }
  0x12   : > { %2318 = sst [smem:[#allocation13_spill]] %s1811_s29  ;;  %s1353_s9 = sadd.s32 4294967295, %s1819_s6  }
  0x13   : > { %2319 = sst [smem:[#allocation14_spill]] %s1815_s30  ;;  %s1354_s10 = sadd.s32 4294967294, %s1819_s6  }
  0x14   : > { %s40_s11 = sadd.s32 1, %s1811_s29  ;;  %s2355_s8 = smov (!%p34_p0, %s36_s8), %s1807_s28 }
  0x15   : > { %s44_s12 = sadd.s32 1, %s1815_s30  ;;  %p92_p1 = scmp.ne.s32.totalorder %s1783_s22, %s1779_s21 }
  0x16   : > { %p38_p2 = scmp.ge.s32.totalorder %s2355_s8, 4  ;;  %p93_p3 = scmp.eq.s32.totalorder %s1819_s6, 0 }
  0x17   : > { %s2357_s7 = smov (%p34_p0, %s33_s7), 0  ;;  %p195_p5 = scmp.ne.s32.totalorder %s1775_s20, %s1771_s19 }
  0x18   : > { %2320 = sst [smem:[#allocation15_spill]] %s2357_s7  ;;  %s2359_s8 = smov (%p38_p2, %s2355_s8), 0 }
  0x19   : > { %2321 = sst [smem:[#allocation16_spill]] %s2359_s8  ;;  %s2361_s11 = smov (!%p38_p2, %s40_s11), %s1811_s29 }
  0x1a   : > { %p1943_p4 = por %p93_p3, %p92_p1  ;;  %p42_p6 = scmp.ge.s32.totalorder %s2361_s11, 4 }
  0x1b   : > { %p196_p7 = scmp.eq.s32.totalorder %s1353_s9, 63  ;;  %p201_p8 = scmp.ne.s32.totalorder %s1771_s19, %s1767_s18 }
  0x1c   : > { %p202_p9 = scmp.eq.s32.totalorder %s1354_s10, 63  ;;  %s2363_s11 = smov (%p42_p6, %s2361_s11), 0 }
  0x1d   : > { %2323 = sst [smem:[#allocation17_spill]] %s2363_s11  ;;  %s2365_s12 = smov (!%p42_p6, %s44_s12), %s1815_s30 }
  0x1e   : > { %p1954_p10 = por %p196_p7, %p195_p5  ;;  %p46_p11 = scmp.ge.s32.totalorder %s2365_s12, 2 }
  0x1f   : > { %p1958_p12 = por %p202_p9, %p201_p8  ;;  %s79_s16 = ssub.s32 %s1807_s28, %s2359_s8 }
  0x20   : > { %s2324_s14 = scalar_select %p1954_p10, 1, 0 }
  0x21   : > { %s181_s17 = ssub.s32 %s1811_s29, %s2363_s11  ;;  %s2367_s12 = smov (%p46_p11, %s2365_s12), 0 }
  0x22   : > { %2325 = sst [smem:[#allocation18_spill]] %s2324_s14  ;;  %s81_s9 = ssub.s32 %s1803_s27, %s2357_s7 }
  0x23   : > { %2327 = sst [smem:[#allocation19_spill]] %s2367_s12  ;;  %s85_s10 = sadd.s32 1, %s1783_s22 }
  0x24   : > { %s78_s18 = ssub.s32 %s1815_s30, %s2367_s12  ;;  %s185_s5 = sadd.s32 1, %s1775_s20 }
  0x25   : > { %s80_s3 = sor.u32 %s79_s16, %s78_s18  ;;  %s182_s4 = sor.u32 %s181_s17, %s78_s18 }
  0x26   : > { %s82_s2 = sor.u32 %s81_s9, %s80_s3  ;;  %p183_p13 = scmp.eq.s32.totalorder %s182_s4, 0 }
  0x27   : > { %p83_p0 = scmp.eq.s32.totalorder %s82_s2, 0  ;;  %p1356_p1 = scmp.ge.s32.totalorder %s1819_s6, 64 }
  0x28   : > { %s1975_s14 = scalar_select %p183_p13, %s1775_s20, %s185_s5  }
  0x29   : > { %s1978_s0 = scalar_select %p83_p0, %s1783_s22, %s85_s10  }
  0x2a   : > { %224 = sbr.rel (%p1356_p1) target bundleno = 62 (0x3e), region = 24 }
  0x2b   : > { %2328 = sst [smem:[#allocation20_spill]] %s1978_s0 }
  0x31   : > { %244 = sbr.rel (!%p1943_p4) target bundleno = 62 (0x3e), region = 32  ;;  %s246_s12 = sand.u32 (%p1943_p4), 1, %s1783_s22  }
  0x32   : > { %s1358_s16 = sshll.u32 (%p1943_p4), %s1807_s28, 3  ;;  %s1357_s18 = sshll.u32 (%p1943_p4), %s246_s12, 4 }
  0x33   : > { %s250_s3 = sadd.s32 (%p1943_p4), %s1803_s27, %s1358_s16  ;;  %s1359_s4 = sshll.u32 (%p1943_p4), %s1815_s30, 5 }
  0x34   : > { %s252_s2 = sadd.s32 (%p1943_p4), %s1359_s4, %s250_s3  ;;  %s2329_s1 = sld [smem:[#allocation22_spill]] (%p1943_p4) }
  0x35   : > { %s1360_s5 = sshll.u32 (%p1943_p4), %s252_s2, 2  ;;  %s248_s13 = scalar_lea.vmem (%p1943_p4), [#allocation6], %s1357_s18 }
  0x3a   : > { %s254_s10 = scalar_lea.vmem %s2329_s1, %s1360_s5 }
  0x3b   : > { %v270_v0 = vld [vmem:[%s254_s10] sm:$0xf]  ;;  %v272_v1 = vld [vmem:[%s254_s10 + $0x8] sm:$0xf]  ;;  %v274_v2 = vld [vmem:[%s254_s10 + $0x10] sm:$0xf] }
  0x3c   : > { %271 = vst [vmem:[%s248_s13] sm:$0xf] %v270_v0  ;;  %273 = vst [vmem:[%s248_s13 + $0x4] sm:$0xf] %v272_v1  ;;  %v276_v3 = vld [vmem:[%s254_s10 + $0x18] sm:$0xf] }
  0x3d   : > { %275 = vst [vmem:[%s248_s13 + $0x8] sm:$0xf] %v274_v2  ;;  %277 = vst [vmem:[%s248_s13 + $0xc] sm:$0xf] %v276_v3 }
  0x3e PF: > { %p1361_p2 = scmp.ge.s32.totalorder %s1819_s6, 1  ;;  %p324_p3 = scmp.lt.s32.totalorder %s1819_s6, 65 }
  0x40   : > { %p325_p4 = pnand %p1361_p2, %p324_p3 }
  0x41   : > { %s331_s12 = sand.u32 (!%p325_p4), 1, %s1779_s21   ;;  %s2301_s16 = sand.u32 (!%p325_p4), 1, %s1771_s19  }
  0x42   : > { %328 = sbr.rel (%p325_p4) target bundleno = 1206 (0x4b6), region = 77  ;;  %s1994_s18 = sshll.u32 (!%p325_p4), %s331_s12, 4 }
  0x43   : > { %s1363_s3 = sshll.u32 (!%p325_p4), %s2301_s16, 6  ;;  %s1999_s4 = sshll.u32 (!%p325_p4), %s1795_s25, 3 }
  0x44   : > { %p385_p5 = scmp.lt.s32.totalorder (!%p325_p4), %s1799_s26, 1  ;;  %p387_p6 = scmp.lt.s32.totalorder (!%p325_p4), %s1791_s24, 3 }
  0x45   : > { %p389_p7 = scmp.lt.s32.totalorder (!%p325_p4), %s1999_s4, 31  ;;  %s1368_s13 = sshll.u32 (!%p325_p4), %s1787_s23, 4 }
  0x46   : > { %p403_p8 = scmp.lt.s32.totalorder (!%p325_p4), %s1368_s13, 31  ;;  %p414_p9 = scmp.eq.s32.totalorder (!%p325_p4), %s1791_s24, 0 }
  0x47   : > { %s2330_s11 = sld [smem:[#allocation21_spill]] (!%p325_p4)  ;;  %p415_p11 = scmp.eq.s32.totalorder (!%p325_p4), %s1787_s23, 0 }
  0x48   : > { %s2021_s27 = scalar_lea.vmem (!%p325_p4), [#allocation7], %s1363_s3 }
  0x49   : > { %s386_s2 = scalar_select %p385_p5, %s1799_s26, 1 }
  0x4a   : > { %s388_s5 = scalar_select %p387_p6, %s1791_s24, 3 }
  0x4b   : > { %s390_s17 = scalar_select %p389_p7, %s1999_s4, 31 }
  0x4c   : > { %s1365_s9 = sshll.u32 %s388_s5, 5  ;;  %s1366_s21 = sshll.u32 %s386_s2, 7 }
  0x4d   : > { %s392_s10 = sadd.s32 %s1365_s9, %s390_s17  ;;  %s2369_s13 = smov (!%p403_p8, %s1368_s13), 31 }
  0x4e   : > { %s394_s12 = sadd.s32 %s1366_s21, %s392_s10  ;;  %p416_p13 = pnand %p415_p11, %p414_p9 }
  0x4f   : > { %s1367_s1 = sshll.u32 %s394_s12, 2  ;;  %s406_s7 = sadd.s32 %s1365_s9, %s2369_s13 }
  0x50   : > { %s2012_s8 = scalar_lea.vmem %s2330_s11, %s1367_s1  ;;  %s408_s30 = sadd.s32 %s1366_s21, %s406_s7 }
  0x51   : > { %s1371_s29 = sshll.u32 %s408_s30, 2  ;;  %s2331_s2 = sld [smem:[#allocation23_spill]] }
  0x52   : > { %s333_s10 = scalar_lea.vmem [#allocation6], %s1994_s18  ;;  %419 = sbr.rel (%p416_p13) target bundleno = 94 (0x5e), region = 85 }
  0x53   : > { %s2332_s16 = sld [smem:[#allocation25_spill]] (!%p416_p13) }
  0x57   : > { %s2018_s17 = scalar_lea.vmem %s2331_s2, %s1371_s29 }
  0x59   : > { %v1372_v4 = vld [vmem:[%s2332_s16] ss:$0 sm:$0xff] }
  0x5a   : > { %427 = vst [vmem:[#allocation5] sm:$0xff] %v1372_v4  ;;  %428 = vst [vmem:[#allocation5 + $0x8] sm:$0xff] %v1372_v4 }
  0x5b   : > { %429 = vst [vmem:[#allocation5 + $0x10] sm:$0xff] %v1372_v4  ;;  %430 = vst [vmem:[#allocation5 + $0x18] sm:$0xff] %v1372_v4 }
  0x5c   : > { %431 = vst [vmem:[#allocation5 + $0x20] sm:$0xff] %v1372_v4  ;;  %432 = vst [vmem:[#allocation5 + $0x28] sm:$0xff] %v1372_v4 }
  0x5d   : > { %433 = vst [vmem:[#allocation5 + $0x30] sm:$0xff] %v1372_v4  ;;  %434 = vst [vmem:[#allocation5 + $0x38] sm:$0xff] %v1372_v4 }
  0x5e PF: > { %p1373_p0 = scmp.ne.s32.totalorder %s1787_s23, 0 }
  0x5f   : > { %vm438_vm0 = vcmask (!%p1373_p0), 7168   ;;  %vm455_vm1 = vcmask (!%p1373_p0), 261120   ;;  %v1821_v5 = vmov (!%p1373_p0), -inf   ;;  %v1822_v6 = vmov (!%p1373_p0), 0.0  }
  0x60   : > { %437 = sbr.rel (%p1373_p0) target bundleno = 108 (0x6c), region = 89  ;;  %439 = vst.msk [vmem:[#allocation2] sm:$0xff] (!%p1373_p0), %vm438_vm0, %v1821_v5  ;;  %440 = vst.msk [vmem:[#allocation2 + $0x8] sm:$0xff] (!%p1373_p0), %vm438_vm0, %v1821_v5 }
  0x61   : > { %441 = vst.msk [vmem:[#allocation2 + $0x10] sm:$0xff] (!%p1373_p0), %vm438_vm0, %v1821_v5  ;;  %442 = vst.msk [vmem:[#allocation2 + $0x18] sm:$0xff] (!%p1373_p0), %vm438_vm0, %v1821_v5 }
  0x62   : > { %443 = vst.msk [vmem:[#allocation2 + $0x20] sm:$0xff] (!%p1373_p0), %vm438_vm0, %v1821_v5  ;;  %444 = vst.msk [vmem:[#allocation2 + $0x28] sm:$0xff] (!%p1373_p0), %vm438_vm0, %v1821_v5 }
  0x63   : > { %445 = vst.msk [vmem:[#allocation2 + $0x30] sm:$0xff] (!%p1373_p0), %vm438_vm0, %v1821_v5  ;;  %446 = vst.msk [vmem:[#allocation2 + $0x38] sm:$0xff] (!%p1373_p0), %vm438_vm0, %v1821_v5 }
  0x64   : > { %447 = vst.msk [vmem:[#allocation3] sm:$0xff] (!%p1373_p0), %vm438_vm0, %v1822_v6  ;;  %448 = vst.msk [vmem:[#allocation3 + $0x8] sm:$0xff] (!%p1373_p0), %vm438_vm0, %v1822_v6 }
  0x65   : > { %449 = vst.msk [vmem:[#allocation3 + $0x10] sm:$0xff] (!%p1373_p0), %vm438_vm0, %v1822_v6  ;;  %450 = vst.msk [vmem:[#allocation3 + $0x18] sm:$0xff] (!%p1373_p0), %vm438_vm0, %v1822_v6 }
  0x66   : > { %451 = vst.msk [vmem:[#allocation3 + $0x20] sm:$0xff] (!%p1373_p0), %vm438_vm0, %v1822_v6  ;;  %452 = vst.msk [vmem:[#allocation3 + $0x28] sm:$0xff] (!%p1373_p0), %vm438_vm0, %v1822_v6 }
  0x67   : > { %453 = vst.msk [vmem:[#allocation3 + $0x30] sm:$0xff] %vm438_vm0, %v1822_v6  ;;  %454 = vst.msk [vmem:[#allocation3 + $0x38] sm:$0xff] %vm438_vm0, %v1822_v6 }
  0x68   : > { %456 = vst.msk [vmem:[#allocation4] sm:$0xff] %vm455_vm1, %v1822_v6  ;;  %457 = vst.msk [vmem:[#allocation4 + $0x8] sm:$0xff] %vm455_vm1, %v1822_v6 }
  0x69   : > { %458 = vst.msk [vmem:[#allocation4 + $0x10] sm:$0xff] %vm455_vm1, %v1822_v6  ;;  %459 = vst.msk [vmem:[#allocation4 + $0x18] sm:$0xff] %vm455_vm1, %v1822_v6 }
  0x6a   : > { %460 = vst.msk [vmem:[#allocation4 + $0x20] sm:$0xff] %vm455_vm1, %v1822_v6  ;;  %461 = vst.msk [vmem:[#allocation4 + $0x28] sm:$0xff] %vm455_vm1, %v1822_v6 }
  0x6b   : > { %462 = vst.msk [vmem:[#allocation4 + $0x30] sm:$0xff] %vm455_vm1, %v1822_v6  ;;  %463 = vst.msk [vmem:[#allocation4 + $0x38] sm:$0xff] %vm455_vm1, %v1822_v6 }
  0x6c PF: > { %v1611_v7 = vld [vmem:[%s333_s10] sm:$0xff]   ;;  %v1612_v8 = vld [vmem:[%s333_s10 + $0x8] sm:$0xff]   ;;  %vm508_vm2 = vcmask 261120   ;;  %v1823_v21 = vmov 0   ;;  %vm746_vm3 = vcmask 7168   ;;  %p968_p1 = scmp.eq.s32.totalorder %s1787_s23, 1 }
  0x6d   : > { %1432 = vmatprep.subr.bf16.mxu0 %v1611_v7  ;;  %v1613_v9 = vld [vmem:[%s2012_s8] sm:$0xff]   ;;  %v1614_v10 = vld [vmem:[%s2012_s8 + $0x8] sm:$0xff]   ;;  %v1615_v11 = vld [vmem:[%s2012_s8 + $0x10] sm:$0xff]   ;;  %1609 = vset.pattern.permute.xlu0 %v1823_v21  ;;  %p1392_p2 = scmp.ne.s32.totalorder %s1787_s23, 1 }
  0x6e   : > { %1433 = vmatpush3.bf16.msra.mxu0 %v1611_v7  ;;  %1436 = vmatprep.mubr.msk.bf16.mxu0 %vm508_vm2, %v1613_v9  ;;  %v1616_v12 = vld [vmem:[%s2012_s8 + $0x18] sm:$0xff]   ;;  %v1617_v22 = vld [vmem:[%s2018_s17] sm:$0xff]   ;;  %v1618_v23 = vld [vmem:[%s2018_s17 + $0x8] sm:$0xff]   ;;  %s1407_s0 = sshll.u32 (!%p1392_p2), %s1791_s24, 4  ;;  %s2333_s29 = sld [smem:[#allocation24_spill]] (!%p1392_p2) }
  0x6f   : > { %1434 = vmatprep.subr.bf16.mxu0 %v1612_v8  ;;  %1610 = vset.pattern.permute.xlu1 %v1823_v21  ;;  %v588_v24 = vld [vmem:[#allocation2 + $0x10] sm:$0xff]  ;;  %v586_v25 = vld [vmem:[#allocation2] sm:$0xff]  ;;  %v589_v30 = vld [vmem:[#allocation2 + $0x18] sm:$0xff] }
  0x70   : > { %1444 = vmatprep.subr.bf16.mxu1 %v1617_v22  ;;  %v587_v31 = vld [vmem:[#allocation2 + $0x8] sm:$0xff]  ;;  %v1619_v32 = vld [vmem:[%s2018_s17 + $0x10] sm:$0xff]   ;;  %v590_v40 = vld [vmem:[#allocation2 + $0x20] sm:$0xff] }
  0x71   : > { %1445 = vmatpush3.bf16.msra.mxu1 %v1617_v22  ;;  %v1620_v41 = vld [vmem:[%s2018_s17 + $0x18] sm:$0xff]   ;;  %v591_v44 = vld [vmem:[#allocation2 + $0x28] sm:$0xff]  ;;  %v2095_v47 = vld [vmem:[#allocation2 + $0x30] sm:$0xff] }
  0x72   : > { %1435 = vmatpush3.bf16.msra.mxu0 %v1612_v8  ;;  %1446 = vmatprep.subr.bf16.mxu1 %v1618_v23  ;;  %v1621_v48 = vld [vmem:[%s2018_s17 + $0x20] sm:$0xff]   ;;  %v2099_v52 = vld [vmem:[#allocation2 + $0x38] sm:$0xff]  ;;  %v1622_v56 = vld [vmem:[%s2018_s17 + $0x28] sm:$0xff]  }
  0x73   : > { %v1623_v0 = vld [vmem:[%s2018_s17 + $0x30] sm:$0xff]   ;;  %v1624_v4 = vld [vmem:[%s2018_s17 + $0x38] sm:$0xff]  }
  0x74   : > { %s1058_s30 = scalar_lea.vmem (!%p1392_p2), %s2333_s29, %s1407_s0 }
  0x75   : > { %1437 = vmatmul.mubr.msk.bf16.vlgmr.msra.gmra.mrb[0].mxu0 %vm508_vm2, %v1614_v10  ;;  %1447 = vmatpush3.bf16.msra.mxu1 %v1618_v23 }
  0x76   : > { %1440 = vmatprep.mubr.msk.bf16.mxu0 %vm508_vm2, %v1615_v11  ;;  %1448 = vmatprep.subr.bf16.mxu1 %v1619_v32 }
  0x79   : > { %1449 = vmatpush3.bf16.msra.mxu1 %v1619_v32 }
  0x7a   : > { %1450 = vmatprep.subr.bf16.mxu1 %v1620_v41 }
  0x7d   : > { %1441 = vmatmul.mubr.msk.bf16.gmra.mrb[4].mxu0 %vm508_vm2, %v1616_v12  ;;  %1451 = vmatpush3.bf16.msra.mxu1 %v1620_v41 }
  0x7e   : > { %1452 = vmatprep.subr.bf16.mxu1 %v1621_v48 }
  0x81   : > { %1453 = vmatpush3.bf16.msra.mxu1 %v1621_v48 }
  0x82   : > { %1454 = vmatprep.subr.bf16.mxu1 %v1622_v56 }
  0x85   : > { %1455 = vmatpush3.bf16.msra.mxu1 %v1622_v56 }
  0x86   : > { %1456 = vmatprep.subr.bf16.mxu1 %v1623_v0 }
  0x89   : > { %1457 = vmatpush3.bf16.msra.mxu1 %v1623_v0  ;;  %v709_v0 = vld [vmem:[#allocation3 + $0x18] sm:$0xff] }
  0x8a   : > { %1458 = vmatprep.subr.bf16.mxu1 %v1624_v4 }
  0x8d   : > { %1459 = vmatpush3.bf16.msra.mxu1 %v1624_v4  ;;  %v707_v4 = vld [vmem:[#allocation3 + $0x8] sm:$0xff] }
 0x148   : > { %v2063_v13 = vpop.f32.mrb[0].mxu0 }
 0x149   : > { %598 = vmax.xlane.f32.xlu1 %v2063_v13  ;;  %v2066_v14 = vpop.f32.mrb[1].mxu0 }
 0x14a   : > { %594 = vmax.xlane.f32.xlu0 %v2066_v14  ;;  %v2069_v15 = vpop.f32.mrb[2].mxu0 }
 0x14b   : > { %v2071_v16 = vpop.f32.mrb[3].mxu0 }
 0x14d   : > { %600 = vmax.xlane.f32.xlu1 %v2069_v15 }
 0x14e   : > { %596 = vmax.xlane.f32.xlu0 %v2071_v16 }
 0x150   : > { %v2075_v17 = vpop.f32.mrb[4].mxu0 }
 0x151   : > { %v2077_v18 = vpop.f32.mrb[5].mxu0 }
 0x152   : > { %602 = vmax.xlane.f32.xlu0 %v2077_v18  ;;  %v2080_v19 = vpop.f32.mrb[6].mxu0 }
 0x153   : > { %v2082_v20 = vpop.f32.mrb[7].mxu0 }
 0x154   : > { %604 = vmax.xlane.f32.xlu1 %v2082_v20 }
 0x156   : > { %606 = vmax.xlane.f32.xlu0 %v2075_v17 }
 0x158   : > { %608 = vmax.xlane.f32.xlu1 %v2080_v19 }
 0x1d6   : > { %v599_v26 = vpop.xlane.xlu1 %598 }
 0x1d7   : > { %v612_v27 = vmax.f32 %v588_v24, %v599_v26  ;;  %v595_v28 = vpop.xlane.xlu0 %594 }
 0x1d8   : > { %v610_v29 = vmax.f32 %v586_v25, %v595_v28 }
 0x1d9   : > { %962 = vst.msk [vmem:[#allocation2 + $0x10] sm:$0xff] %vm746_vm3, %v612_v27  ;;  %654 = vperm.xlu1 %1610, %v612_v27   ;;  %v620_v50 = vsub.f32 %v588_v24, %v612_v27 }
 0x1da   : > { %v618_v33 = vsub.f32 %v586_v25, %v610_v29  ;;  %960 = vst.msk [vmem:[#allocation2] sm:$0xff] %vm746_vm3, %v610_v29  ;;  %v601_v34 = vpop.xlane.xlu1 %600  ;;  %644 = vperm.xlu0 %1609, %v610_v29  }
 0x1db   : > { %v613_v35 = vmax.f32 %v589_v30, %v601_v34  ;;  %v597_v36 = vpop.xlane.xlu0 %596  ;;  %v630_v60 = vmul.f32 1.442695, %v620_v50 }
 0x1dc   : > { %v626_v37 = vmul.f32 1.442695, %v618_v33  ;;  %v611_v38 = vmax.f32 %v587_v31, %v597_v36 }
 0x1dd   : > { %v621_v39 = vsub.f32 %v589_v30, %v613_v35  ;;  %963 = vst.msk [vmem:[#allocation2 + $0x18] sm:$0xff] %vm746_vm3, %v613_v35  ;;  %659 = vperm.xlu1 %1610, %v613_v35  }
 0x1de   : > { %1625 = vpow2.f32 %v626_v37  ;;  %961 = vst.msk [vmem:[#allocation2 + $0x8] sm:$0xff] %vm746_vm3, %v611_v38  ;;  %v619_v61 = vsub.f32 %v587_v31, %v611_v38 }
 0x1df   : > { %v632_v42 = vmul.f32 1.442695, %v621_v39  ;;  %v603_v43 = vpop.xlane.xlu0 %602 }
 0x1e0   : > { %v614_v45 = vmax.f32 %v590_v40, %v603_v43  ;;  %v628_v2 = vmul.f32 1.442695, %v619_v61 }
 0x1e1   : > { %1627 = vpow2.f32 %v632_v42  ;;  %649 = vperm.xlu1 %1610, %v611_v38   ;;  %v605_v46 = vpop.xlane.xlu1 %604 }
 0x1e2   : > { %964 = vst.msk [vmem:[#allocation2 + $0x20] sm:$0xff] %vm746_vm3, %v614_v45  ;;  %v615_v49 = vmax.f32 %v591_v44, %v605_v46  ;;  %v622_v3 = vsub.f32 %v590_v40, %v614_v45 }
 0x1e3   : > { %v607_v51 = vpop.xlane.xlu0 %606 }
 0x1e4   : > { %v623_v53 = vsub.f32 %v591_v44, %v615_v49  ;;  %965 = vst.msk [vmem:[#allocation2 + $0x28] sm:$0xff] %vm746_vm3, %v615_v49  ;;  %v2103_v54 = vmax.f32 %v2095_v47, %v607_v51  ;;  %v634_v5 = vmul.f32 1.442695, %v622_v3 }
 0x1e5   : > { %v609_v55 = vpop.xlane.xlu1 %608 }
 0x1e6   : > { %v636_v57 = vmul.f32 1.442695, %v623_v53  ;;  %v624_v58 = vsub.f32 %v2095_v47, %v2103_v54  ;;  %966 = vst.msk [vmem:[#allocation2 + $0x30] sm:$0xff] %vm746_vm3, %v2103_v54  ;;  %v2111_v59 = vmax.f32 %v2099_v52, %v609_v55  ;;  %674 = vperm.xlu1 %1610, %v2103_v54  }
 0x1e8   : > { %v2114_v62 = vpop.eup %1625  ;;  %1629 = vpow2.f32 %v636_v57  ;;  %v625_v63 = vsub.f32 %v2099_v52, %v2111_v59  ;;  %967 = vst.msk [vmem:[#allocation2 + $0x38] sm:$0xff] %vm746_vm3, %v2111_v59  ;;  %v708_v57 = vld [vmem:[#allocation3 + $0x10] sm:$0xff] }
 0x1e9   : > { %765 = vperm.xlu0 %1609, %v2114_v62   ;;  %1631 = vpow2.f32 %v630_v60  ;;  %v706_v60 = vld [vmem:[#allocation3] sm:$0xff] }
 0x1ea   : > { %664 = vperm.xlu1 %1610, %v614_v45   ;;  %1633 = vpow2.f32 %v628_v2  ;;  %v640_v46 = vmul.f32 1.442695, %v625_v63  ;;  %v714_v54 = vmul.f32 %v2114_v62, %v706_v60  ;;  %v712_v62 = vld [vmem:[#allocation3 + $0x30] sm:$0xff] }
 0x1eb   : > { %v2122_v1 = vpop.eup %1627  ;;  %1635 = vpow2.f32 %v634_v5 }
 0x1ec   : > { %v717_v3 = vmul.f32 %v2122_v1, %v709_v0 }
 0x1ed   : > { %780 = vperm.xlu0 %1609, %v2122_v1  }
 0x1ee   : > { %669 = vperm.xlu1 %1610, %v615_v49  }
 0x1f2   : > { %v2126_v6 = vpop.eup %1629  ;;  %679 = vperm.xlu1 %1610, %v2111_v59  }
 0x1f3   : > { %790 = vperm.xlu0 %1609, %v2126_v6   ;;  %v2130_v7 = vpop.eup %1631 }
 0x1f4   : > { %v2133_v8 = vpop.eup %1633  ;;  %v716_v61 = vmul.f32 %v2130_v7, %v708_v57 }
 0x1f5   : > { %v2136_v9 = vpop.eup %1635 }
 0x1f6   : > { %775 = vperm.xlu1 %1610, %v2130_v7  }
 0x1fa   : > { %770 = vperm.xlu1 %1610, %v2133_v8  }
 0x1fe   : > { %785 = vperm.xlu1 %1610, %v2136_v9  }
 0x258   : > { %v655_v10 = vpop.permute.xlu1 %654 }
 0x259   : > { %v684_v11 = vsub.f32 %v2063_v13, %v655_v10  ;;  %v645_v12 = vpop.permute.xlu0 %644 }
 0x25a   : > { %v682_v21 = vsub.f32 %v2066_v14, %v645_v12 }
 0x25b   : > { %v694_v22 = vmul.f32 1.442695, %v684_v11  ;;  %v715_v11 = vmul.f32 %v2133_v8, %v707_v4  ;;  %v713_v8 = vld [vmem:[#allocation3 + $0x38] sm:$0xff] }
 0x25c   : > { %v690_v23 = vmul.f32 1.442695, %v682_v21  ;;  %v660_v24 = vpop.permute.xlu1 %659 }
 0x25d   : > { %1637 = vpow2.f32 %v694_v22  ;;  %v685_v25 = vsub.f32 %v2069_v15, %v660_v24 }
 0x25e   : > { %1639 = vpow2.f32 %v690_v23  ;;  %v710_v23 = vld [vmem:[#allocation3 + $0x20] sm:$0xff] }
 0x25f   : > { %v696_v26 = vmul.f32 1.442695, %v685_v25  ;;  %v718_v1 = vmul.f32 %v2136_v9, %v710_v23  ;;  %v758_v9 = vld [vmem:[#allocation4 + $0x18] sm:$0xff] }
 0x260   : > { %v650_v27 = vpop.permute.xlu1 %649 }
 0x261   : > { %1641 = vpow2.f32 %v696_v26  ;;  %v683_v28 = vsub.f32 %v2071_v16, %v650_v27 }
 0x263   : > { %v692_v29 = vmul.f32 1.442695, %v683_v28 }
 0x265   : > { %1643 = vpow2.f32 %v692_v29  ;;  %v675_v30 = vpop.permute.xlu1 %674  ;;  %v711_v29 = vld [vmem:[#allocation3 + $0x28] sm:$0xff] }
 0x266   : > { %v688_v13 = vsub.f32 %v2075_v17, %v675_v30 }
 0x267   : > { %v1638_v31 = vpop.eup %1637 }
 0x268   : > { %v1640_v32 = vpop.eup %1639  ;;  %v702_v14 = vmul.f32 1.442695, %v688_v13  ;;  %726 = vadd.xlane.f32.xlu0 %v1638_v31  ;;  %v766_v53 = vpop.permute.xlu0 %765  ;;  %v719_v13 = vmul.f32 %v2126_v6, %v711_v29 }
 0x269   : > { %722 = vadd.xlane.f32.xlu1 %v1640_v32  ;;  %v665_v33 = vpop.permute.xlu1 %664 }
 0x26a   : > { %1645 = vpow2.f32 %v702_v14  ;;  %v686_v15 = vsub.f32 %v2077_v18, %v665_v33  ;;  %v757_v14 = vld [vmem:[#allocation4 + $0x10] sm:$0xff]  ;;  %v755_v33 = vld [vmem:[#allocation4] sm:$0xff] }
 0x26b   : > { %v1642_v34 = vpop.eup %1641 }
 0x26c   : > { %v698_v35 = vmul.f32 1.442695, %v686_v15  ;;  %v812_v36 = vpack.c.bf16 %v1642_v34, %v1638_v31  ;;  %v781_v52 = vpop.permute.xlu0 %780 }
 0x26d   : > { %728 = vadd.xlane.f32.xlu1 %v1642_v34  ;;  %v670_v37 = vpop.permute.xlu1 %669  ;;  %v756_v34 = vld [vmem:[#allocation4 + $0x8] sm:$0xff] }
 0x26e   : > { %1647 = vpow2.f32 %v698_v35  ;;  %v687_v16 = vsub.f32 %v2082_v20, %v670_v37  ;;  %v803_v35 = vmul.f32 %v766_v53, %v755_v33  ;;  %v806_v37 = vmul.f32 %v781_v52, %v758_v9 }
 0x26f   : > { %v1644_v38 = vpop.eup %1643 }
 0x270   : > { %v700_v39 = vmul.f32 1.442695, %v687_v16  ;;  %724 = vadd.xlane.f32.xlu0 %v1644_v38  ;;  %v811_v17 = vpack.c.bf16 %v1644_v38, %v1640_v32 }
 0x271   : > { %v680_v40 = vpop.permute.xlu1 %679 }
 0x272   : > { %1649 = vpow2.f32 %v700_v39  ;;  %v689_v41 = vsub.f32 %v2080_v19, %v680_v40  ;;  %1460 = vmatprep.mubr.bf16.mxu1 %v811_v17  ;;  %v638_v19 = vmul.f32 1.442695, %v624_v58  ;;  %v2154_v56 = vpop.permute.xlu0 %790 }
 0x273   : > { %1461 = vmatmul.mubr.bf16.vlgmr.msra.gmra.mrb[0].mxu1 %v812_v36 }
 0x274   : > { %v1646_v42 = vpop.eup %1645  ;;  %v704_v18 = vmul.f32 1.442695, %v689_v41 }
 0x275   : > { %734 = vadd.xlane.f32.xlu0 %v1646_v42  ;;  %v776_v51 = vpop.permute.xlu1 %775 }
 0x276   : > { %1651 = vpow2.f32 %v704_v18  ;;  %v805_v15 = vmul.f32 %v776_v51, %v757_v14  ;;  %v761_v18 = vld [vmem:[#allocation4 + $0x30] sm:$0xff] }
 0x277   : > { %1653 = vpow2.f32 %v640_v46  ;;  %v760_v46 = vld [vmem:[#allocation4 + $0x28] sm:$0xff] }
 0x278   : > { %v1648_v43 = vpop.eup %1647  ;;  %1655 = vpow2.f32 %v638_v19 }
 0x279   : > { %730 = vadd.xlane.f32.xlu0 %v1648_v43  ;;  %v771_v55 = vpop.permute.xlu1 %770 }
 0x27a   : > { %v804_v39 = vmul.f32 %v771_v55, %v756_v34  ;;  %v808_v55 = vmul.f32 %v2154_v56, %v760_v46  ;;  %v1824_v56 = vmov (!%p1392_p2), 0  }
 0x27c   : > { %v1650_v44 = vpop.eup %1649 }
 0x27d   : > { %v813_v45 = vpack.c.bf16 %v1650_v44, %v1648_v43  ;;  %v2156_v59 = vpop.permute.xlu1 %785 }
 0x27f   : > { %1464 = vmatprep.mubr.bf16.mxu1 %v813_v45  ;;  %v762_v45 = vld [vmem:[#allocation4 + $0x38] sm:$0xff] }
 0x280   : > { %v1652_v20 = vpop.eup %1651 }
 0x281   : > { %736 = vadd.xlane.f32.xlu1 %v1652_v20  ;;  %v814_v48 = vpack.c.bf16 %v1652_v20, %v1646_v42  ;;  %v1654_v49 = vpop.eup %1653 }
 0x282   : > { %v1656_v50 = vpop.eup %1655  ;;  %v721_v27 = vmul.f32 %v1654_v49, %v713_v8 }
 0x283   : > { %1465 = vmatmul.mubr.bf16.gmra.mrb[4].mxu1 %v814_v48  ;;  %v720_v21 = vmul.f32 %v1656_v50, %v712_v62 }
 0x285   : > { %732 = vadd.xlane.f32.xlu1 %v1650_v44  ;;  %v759_v44 = vld [vmem:[#allocation4 + $0x20] sm:$0xff] }
 0x286   : > { %v807_v19 = vmul.f32 %v2156_v59, %v759_v44  ;;  %v1044_v44 = vld [vmem:[#allocation5] sm:$0xff] (!%p1392_p2) }
 0x28f   : > { %800 = vperm.xlu0 %1609, %v1654_v49  }
 0x293   : > { %1657 = vset.pattern.permute.xlu0 (!%p1392_p2), %v1824_v56 }
 0x296   : > { %795 = vperm.xlu1 %1610, %v1656_v50  }
 0x29a   : > { %1658 = vset.pattern.permute.xlu1 (!%p1392_p2), %v1824_v56 }
 0x2f5   : > { %v727_v47 = vpop.xlane.xlu0 %726 }
 0x2f6   : > { %v740_v58 = vadd.f32 %v727_v47, %v716_v61  ;;  %v723_v63 = vpop.xlane.xlu1 %722 }
 0x2f7   : > { %v738_v2 = vadd.f32 %v723_v63, %v714_v54 }
 0x2f8   : > { %749 = vst.msk [vmem:[#allocation3 + $0x10] sm:$0xff] %vm746_vm3, %v740_v58 }
 0x2f9   : > { %747 = vst.msk [vmem:[#allocation3] sm:$0xff] %vm746_vm3, %v738_v2 }
 0x2fa   : > { %v729_v5 = vpop.xlane.xlu1 %728 }
 0x2fb   : > { %v741_v10 = vadd.f32 %v729_v5, %v717_v3 }
 0x2fd   : > { %750 = vst.msk [vmem:[#allocation3 + $0x18] sm:$0xff] %vm746_vm3, %v741_v10  ;;  %v725_v7 = vpop.xlane.xlu0 %724 }
 0x2fe   : > { %v739_v12 = vadd.f32 %v725_v7, %v715_v11 }
 0x2ff   : > { %v982_v2 = vld [vmem:[#allocation3 + $0x10] sm:$0xff] (!%p1392_p2) }
 0x300   : > { %748 = vst.msk [vmem:[#allocation3 + $0x8] sm:$0xff] %vm746_vm3, %v739_v12  ;;  %v980_v54 = vld [vmem:[#allocation3] sm:$0xff] (!%p1392_p2) }
 0x301   : > { %v1659_v12 = vld [vmem:[%s1058_s30] sm:$0xff] (!%p1392_p2)  }
 0x302   : > { %v735_v22 = vpop.xlane.xlu0 %734  ;;  %1468 = vmatprep.subr.bf16.mxu0 (!%p1392_p2), %v1659_v12  ;;  %1480 = vmatprep.subr.bf16.mxu1 (!%p1392_p2), %v1659_v12 }
 0x303   : > { %v744_v24 = vadd.f32 %v735_v22, %v720_v21  ;;  %1469 = vmatpush3.bf16.msra.mxu0 (!%p1392_p2), %v1659_v12  ;;  %v1660_v22 = vld [vmem:[%s1058_s30 + $0x8] sm:$0xff] (!%p1392_p2)   ;;  %1482 = vmatpush3.bf16.msra.mxu1 (!%p1392_p2), %v1659_v12 }
 0x304   : > { %v983_v0 = vld [vmem:[#allocation3 + $0x18] sm:$0xff] (!%p1392_p2)  ;;  %1470 = vmatprep.subr.bf16.mxu0 (!%p1392_p2), %v1660_v22  ;;  %1481 = vmatprep.subr.bf16.mxu1 (!%p1392_p2), %v1660_v22 }
 0x305   : > { %753 = vst.msk [vmem:[#allocation3 + $0x30] sm:$0xff] %vm746_vm3, %v744_v24 }
 0x306   : > { %v731_v25 = vpop.xlane.xlu0 %730 }
 0x307   : > { %v742_v26 = vadd.f32 %v731_v25, %v718_v1  ;;  %v981_v63 = vld [vmem:[#allocation3 + $0x8] sm:$0xff] (!%p1392_p2)  ;;  %1471 = vmatpush3.bf16.msra.mxu0 (!%p1392_p2), %v1660_v22  ;;  %1483 = vmatpush3.bf16.msra.mxu1 (!%p1392_p2), %v1660_v22 }
 0x309   : > { %751 = vst.msk [vmem:[#allocation3 + $0x20] sm:$0xff] %vm746_vm3, %v742_v26 }
 0x30c   : > { %v986_v4 = vld [vmem:[#allocation3 + $0x30] sm:$0xff] (!%p1392_p2) }
 0x30e   : > { %v737_v28 = vpop.xlane.xlu1 %736  ;;  %v801_v20 = vpop.permute.xlu0 %800 }
 0x30f   : > { %v745_v30 = vadd.f32 %v737_v28, %v721_v27  ;;  %v810_v50 = vmul.f32 %v801_v20, %v762_v45  ;;  %v1047_v20 = vld [vmem:[#allocation5 + $0x18] sm:$0xff] (!%p1392_p2) }
 0x310   : > { %v984_v59 = vld [vmem:[#allocation3 + $0x20] sm:$0xff] (!%p1392_p2) }
 0x311   : > { %754 = vst.msk [vmem:[#allocation3 + $0x38] sm:$0xff] %vm746_vm3, %v745_v30  ;;  %1661 = vrcp.f32 (!%p1392_p2), %v984_v59 }
 0x312   : > { %v733_v31 = vpop.xlane.xlu1 %732  ;;  %1663 = vrcp.f32 (!%p1392_p2), %v980_v54  ;;  %v1049_v54 = vld [vmem:[#allocation5 + $0x28] sm:$0xff] (!%p1392_p2) }
 0x313   : > { %v743_v32 = vadd.f32 %v733_v31, %v719_v13 }
 0x315   : > { %752 = vst.msk [vmem:[#allocation3 + $0x28] sm:$0xff] %vm746_vm3, %v743_v32 }
 0x316   : > { %v796_v43 = vpop.permute.xlu1 %795 }
 0x317   : > { %v809_v48 = vmul.f32 %v796_v43, %v761_v18  ;;  %v1046_v43 = vld [vmem:[#allocation5 + $0x10] sm:$0xff] (!%p1392_p2) }
 0x318   : > { %v987_v3 = vld [vmem:[#allocation3 + $0x38] sm:$0xff] (!%p1392_p2) }
 0x31b   : > { %v1662_v5 = vpop.eup (!%p1392_p2), %1661 }
 0x31c   : > { %v985_v58 = vld [vmem:[#allocation3 + $0x28] sm:$0xff] (!%p1392_p2)  ;;  %v1664_v10 = vpop.eup (!%p1392_p2), %1663  ;;  %1018 = vperm.xlu1 (!%p1392_p2), %1658, %v1662_v5  }
 0x31d   : > { %1665 = vrcp.f32 (!%p1392_p2), %v985_v58  ;;  %998 = vperm.xlu0 (!%p1392_p2), %1657, %v1664_v10  }
 0x31e   : > { %1667 = vrcp.f32 (!%p1392_p2), %v981_v63 }
 0x31f   : > { %1669 = vrcp.f32 (!%p1392_p2), %v983_v0 }
 0x320   : > { %1671 = vrcp.f32 (!%p1392_p2), %v982_v2 }
 0x321   : > { %1673 = vrcp.f32 (!%p1392_p2), %v987_v3 }
 0x322   : > { %1675 = vrcp.f32 (!%p1392_p2), %v986_v4 }
 0x327   : > { %v1666_v11 = vpop.eup (!%p1392_p2), %1665 }
 0x328   : > { %v1668_v7 = vpop.eup (!%p1392_p2), %1667  ;;  %1023 = vperm.xlu1 (!%p1392_p2), %1658, %v1666_v11  }
 0x329   : > { %v1670_v62 = vpop.eup (!%p1392_p2), %1669  ;;  %1003 = vperm.xlu0 (!%p1392_p2), %1657, %v1668_v7  }
 0x32a   : > { %v1672_v21 = vpop.eup (!%p1392_p2), %1671 }
 0x32b   : > { %v1674_v23 = vpop.eup (!%p1392_p2), %1673 }
 0x32c   : > { %1013 = vperm.xlu1 (!%p1392_p2), %1658, %v1670_v62   ;;  %v1676_v24 = vpop.eup (!%p1392_p2), %1675 }
 0x32d   : > { %1008 = vperm.xlu0 (!%p1392_p2), %1657, %v1672_v21  }
 0x330   : > { %1033 = vperm.xlu1 (!%p1392_p2), %1658, %v1674_v23  }
 0x331   : > { %1028 = vperm.xlu0 (!%p1392_p2), %1657, %v1676_v24  }
 0x346   : > { %v1462_v36 = vpop.f32.mrb[0].mxu1 }
 0x347   : > { %v946_v16 = vadd.f32 %v1462_v36, %v805_v15  ;;  %v913_v38 = vpop.f32.mrb[1].mxu1 }
 0x348   : > { %v944_v17 = vadd.f32 %v913_v38, %v803_v35  ;;  %v1463_v40 = vpop.f32.mrb[2].mxu1 }
 0x349   : > { %954 = vst.msk [vmem:[#allocation4 + $0x10] sm:$0xff] %vm508_vm2, %v946_v16  ;;  %v947_v6 = vadd.f32 %v1463_v40, %v806_v37  ;;  %v916_v41 = vpop.f32.mrb[3].mxu1 }
 0x34a   : > { %952 = vst.msk [vmem:[#allocation4] sm:$0xff] %vm508_vm2, %v944_v17  ;;  %v945_v42 = vadd.f32 %v916_v41, %v804_v39 }
 0x34b   : > { %955 = vst.msk [vmem:[#allocation4 + $0x18] sm:$0xff] %vm508_vm2, %v947_v6 }
 0x34c   : > { %953 = vst.msk [vmem:[#allocation4 + $0x8] sm:$0xff] %vm508_vm2, %v945_v42 }
 0x350   : > { %v974_v9 = vld [vmem:[#allocation4 + $0x10] sm:$0xff] (!%p1392_p2) }
 0x351   : > { %v972_v27 = vld [vmem:[#allocation4] sm:$0xff] (!%p1392_p2) }
 0x352   : > { %v975_v33 = vld [vmem:[#allocation4 + $0x18] sm:$0xff] (!%p1392_p2) }
 0x353   : > { %v973_v28 = vld [vmem:[#allocation4 + $0x8] sm:$0xff] (!%p1392_p2) }
 0x356   : > { %v1466_v49 = vpop.f32.mrb[4].mxu1  ;;  %971 = sbr.rel (%p1392_p2) target bundleno = 1167 (0x48f), region = 93 }
 0x357   : > { %v950_v51 = vadd.f32 %v1466_v49, %v809_v48  ;;  %v929_v53 = vpop.f32.mrb[5].mxu1 }
 0x358   : > { %v948_v52 = vadd.f32 %v929_v53, %v807_v19  ;;  %v1467_v57 = vpop.f32.mrb[6].mxu1  ;;  %v1045_v19 = vld [vmem:[#allocation5 + $0x8] sm:$0xff] (!%p1392_p2) }
 0x359   : > { %958 = vst.msk [vmem:[#allocation4 + $0x30] sm:$0xff] %vm508_vm2, %v950_v51  ;;  %v951_v60 = vadd.f32 %v1467_v57, %v810_v50  ;;  %v932_v61 = vpop.f32.mrb[7].mxu1  ;;  %v1050_v51 = vld [vmem:[#allocation5 + $0x30] sm:$0xff] (!%p1392_p2) }
 0x35a   : > { %956 = vst.msk [vmem:[#allocation4 + $0x20] sm:$0xff] %vm508_vm2, %v948_v52  ;;  %v949_v47 = vadd.f32 %v932_v61, %v808_v55  ;;  %v1048_v52 = vld [vmem:[#allocation5 + $0x20] sm:$0xff] (!%p1392_p2)  ;;  %v1051_v61 = vld [vmem:[#allocation5 + $0x38] sm:$0xff] (!%p1392_p2) }
 0x35b   : > { %959 = vst.msk [vmem:[#allocation4 + $0x38] sm:$0xff] %vm508_vm2, %v951_v60 }
 0x35c   : > { %957 = vst.msk [vmem:[#allocation4 + $0x28] sm:$0xff] %vm508_vm2, %v949_v47 }
 0x360   : > { %v978_v39 = vld [vmem:[#allocation4 + $0x30] sm:$0xff] }
 0x361   : > { %v976_v26 = vld [vmem:[#allocation4 + $0x20] sm:$0xff] }
 0x362   : > { %v979_v38 = vld [vmem:[#allocation4 + $0x38] sm:$0xff] }
 0x363   : > { %v977_v8 = vld [vmem:[#allocation4 + $0x28] sm:$0xff] }
 0x39b   : > { %v1019_v1 = vpop.permute.xlu1 %1018 }
 0x39c   : > { %v999_v25 = vpop.permute.xlu0 %998  ;;  %v1040_v30 = vmul.f32 %v1019_v1, %v976_v26 }
 0x39d   : > { %v1036_v32 = vmul.f32 %v999_v25, %v972_v27 }
 0x3a7   : > { %v1024_v29 = vpop.permute.xlu1 %1023 }
 0x3a8   : > { %v1041_v13 = vmul.f32 %v1024_v29, %v977_v8  ;;  %v1004_v31 = vpop.permute.xlu0 %1003 }
 0x3a9   : > { %v1037_v14 = vmul.f32 %v1004_v31, %v973_v28 }
 0x3aa   : > { %v1054_v15 = vpack.c.bf16 %v1041_v13, %v1040_v30 }
 0x3ab   : > { %v1014_v34 = vpop.permute.xlu1 %1013  ;;  %v1052_v35 = vpack.c.bf16 %v1037_v14, %v1036_v32 }
 0x3ac   : > { %v1039_v36 = vmul.f32 %v1014_v34, %v975_v33  ;;  %v1009_v37 = vpop.permute.xlu0 %1008  ;;  %1476 = vmatprep.mubr.msk.bf16.mxu1 %vm508_vm2, %v1054_v15 }
 0x3ad   : > { %v1038_v16 = vmul.f32 %v1009_v37, %v974_v9  ;;  %1472 = vmatprep.mubr.msk.bf16.mxu0 %vm508_vm2, %v1052_v35 }
 0x3af   : > { %v1053_v17 = vpack.c.bf16 %v1039_v36, %v1038_v16  ;;  %v1034_v40 = vpop.permute.xlu1 %1033 }
 0x3b0   : > { %v1043_v6 = vmul.f32 %v1034_v40, %v979_v38  ;;  %v1029_v41 = vpop.permute.xlu0 %1028 }
 0x3b1   : > { %v1042_v42 = vmul.f32 %v1029_v41, %v978_v39  ;;  %1473 = vmatmul.mubr.msk.bf16.vlgmr.msra.gmra.mrb[0].mxu0 %vm508_vm2, %v1053_v17 }
 0x3b3   : > { %v1055_v18 = vpack.c.bf16 %v1043_v6, %v1042_v42 }
 0x3b5   : > { %1477 = vmatmul.mubr.msk.bf16.vlgmr.msra.gmra.mrb[0].mxu1 %vm508_vm2, %v1055_v18 }
 0x484   : > { %v1474_v45 = vpop.f32.mrb[0].mxu0 }
 0x485   : > { %v1154_v46 = vadd.f32 %v1474_v45, %v1046_v43  ;;  %v1121_v48 = vpop.f32.mrb[1].mxu0 }
 0x486   : > { %v1152_v49 = vadd.f32 %v1121_v48, %v1044_v44  ;;  %v1475_v50 = vpop.f32.mrb[2].mxu0 }
 0x487   : > { %1162 = vst [vmem:[#allocation5 + $0x10] sm:$0xff] %v1154_v46  ;;  %v1155_v53 = vadd.f32 %v1475_v50, %v1047_v20  ;;  %v1124_v55 = vpop.f32.mrb[3].mxu0 }
 0x488   : > { %1160 = vst [vmem:[#allocation5] sm:$0xff] %v1152_v49  ;;  %v1153_v57 = vadd.f32 %v1124_v55, %v1045_v19  ;;  %v1478_v60 = vpop.f32.mrb[0].mxu1 }
 0x489   : > { %1163 = vst [vmem:[#allocation5 + $0x18] sm:$0xff] %v1155_v53  ;;  %v1158_v47 = vadd.f32 %v1478_v60, %v1050_v51  ;;  %v1137_v59 = vpop.f32.mrb[1].mxu1 }
 0x48a   : > { %1161 = vst [vmem:[#allocation5 + $0x8] sm:$0xff] %v1153_v57  ;;  %v1156_v58 = vadd.f32 %v1137_v59, %v1048_v52  ;;  %v1479_v56 = vpop.f32.mrb[2].mxu1 }
 0x48b   : > { %1166 = vst [vmem:[#allocation5 + $0x30] sm:$0xff] %v1158_v47  ;;  %v1159_v63 = vadd.f32 %v1479_v56, %v1051_v61  ;;  %v1140_v0 = vpop.f32.mrb[3].mxu1 }
 0x48c   : > { %1164 = vst [vmem:[#allocation5 + $0x20] sm:$0xff] %v1156_v58  ;;  %v1157_v2 = vadd.f32 %v1140_v0, %v1049_v54 }
 0x48d   : > { %1167 = vst [vmem:[#allocation5 + $0x38] sm:$0xff] %v1159_v63 }
 0x48e   : > { %1165 = vst [vmem:[#allocation5 + $0x28] sm:$0xff] %v1157_v2 }
 0x48f PF: > { %p1168_p3 = scmp.eq.s32.totalorder %s1791_s24, 3 }
 0x491   : > { %p1169_p4 = pnand %p1168_p3, %p968_p1 }
 0x492   : > { %v1173_v3 = vld [vmem:[#allocation5] sm:$0xff] (!%p1169_p4)  ;;  %v1174_v4 = vld [vmem:[#allocation5 + $0x8] sm:$0xff] (!%p1169_p4)  ;;  %v1175_v5 = vld [vmem:[#allocation5 + $0x10] sm:$0xff] (!%p1169_p4) }
 0x493   : > { %1172 = sbr.rel (%p1169_p4) target bundleno = 1178 (0x49a), region = 97  ;;  %1181 = vst [vmem:[%s2021_s27] sm:$0xff] (!%p1169_p4), %v1173_v3  ;;  %1182 = vst [vmem:[%s2021_s27 + $0x8] sm:$0xff] (!%p1169_p4), %v1174_v4  ;;  %v1176_v10 = vld [vmem:[#allocation5 + $0x18] sm:$0xff] (!%p1169_p4)  ;;  %v1177_v11 = vld [vmem:[#allocation5 + $0x20] sm:$0xff] (!%p1169_p4) }
 0x494   : > { %1183 = vst [vmem:[%s2021_s27 + $0x10] sm:$0xff] (!%p1169_p4), %v1175_v5  ;;  %1184 = vst [vmem:[%s2021_s27 + $0x18] sm:$0xff] (!%p1169_p4), %v1176_v10  ;;  %v1179_v12 = vld [vmem:[#allocation5 + $0x30] sm:$0xff] (!%p1169_p4)  ;;  %v1180_v62 = vld [vmem:[#allocation5 + $0x38] sm:$0xff] (!%p1169_p4) }
 0x495   : > { %v1178_v7 = vld [vmem:[#allocation5 + $0x28] sm:$0xff] (!%p1169_p4)  ;;  %1185 = vst [vmem:[%s2021_s27 + $0x20] sm:$0xff] (!%p1169_p4), %v1177_v11  ;;  %1187 = vst [vmem:[%s2021_s27 + $0x30] sm:$0xff] (!%p1169_p4), %v1179_v12 }
 0x496   : > { %1186 = vst [vmem:[%s2021_s27 + $0x28] sm:$0xff] (!%p1169_p4), %v1178_v7  ;;  %1188 = vst [vmem:[%s2021_s27 + $0x38] sm:$0xff] (!%p1169_p4), %v1180_v62 }
 0x49a PF: > { %s1403_s24 = sshll.u32 %s1799_s26, 5  ;;  %s1205_s8 = sshll.u32 %s2021_s27, 4  ;;  %s2205_s8 = int_to_ptr.vmem [resolvable:$true] %s1205_s8 }
 0x49b   : > { %s1202_s7 = sadd.s32 %s1403_s24, %s1999_s4  ;;  %s2335_s9 = sld [smem:[#allocation26_spill]] }
 0x49c   : > { %s1404_s11 = sshll.u32 %s1202_s7, 7  ;;  %s2336_s13 = sand.u32 1, %s1771_s19  }
 0x49d   : > { %s2214_s25 = scalar_lea.sflag [#allocation8], %s2336_s13  ;;  %s1677_s5 = scalar_lea.vmem %s2205_s8, 1024 }
 0x49e   : > { %p1678_p5 = scmp.ne.s32.totalorder %s2205_s8, %s1677_s5  ;;  %s1825_s26 = smov [#allocation7]  }
 0x49f   : > { %s1681_s27 = sshll.u32 %s1825_s26, 4  ;;  %s1682_s27 = int_to_ptr.vmem [resolvable:$false] %s1681_s27 }
 0x4a0   : > { %p1679_p6 = pnand %p1678_p5, %p1954_p10  ;;  %s1683_s4 = scalar_lea.vmem %s1682_s27, 2048 }
 0x4a1   : > { %s2210_s21 = scalar_lea.hbm %s2335_s9, %s1404_s11  ;;  %p1684_p8 = scmp.lt.s32.totalorder %s2205_s8, %s1682_s27 }
 0x4a2   : > { %p1680_p7 = pneg %p1679_p6  ;;  %p1685_p9 = scmp.lt.s32.totalorder %s1683_s4, %s1677_s5 }
 0x4a4   : > { %p1686_p11 = por %p1685_p9, %p1684_p8 }
 0x4a6   : > { %p1687_p13 = pnand %p1686_p11, %p1680_p7 }
 0x4a8   : > { %1690 = shalt.err (!%p1687_p13)
}
 0x4a9   : > { %s1691_s2 = scalar_lea.hbm %s2210_s21, 1024  ;;  %s1695_s12 = scalar_lea.hbm %s2335_s9, 8192 }
 0x4aa   : > { %p1692_p0 = scmp.ne.s32.totalorder %s2210_s21, %s1691_s2  ;;  %p1696_p3 = scmp.lt.u32.totalorder %s2210_s21, %s2335_s9 }
 0x4ab   : > { %p1697_p4 = scmp.lt.u32.totalorder %s1695_s12, %s1691_s2  ;;  %p1699_p6 = scmp.lt.u32.totalorder %s1691_s2, %s2210_s21 }
 0x4ac   : > { %p1693_p1 = pnand %p1692_p0, %p1954_p10 }
 0x4ad   : > { %p1698_p5 = por %p1697_p4, %p1696_p3 }
 0x4ae   : > { %p1694_p2 = pneg %p1693_p1 }
 0x4af   : > { %p1700_p7 = por %p1699_p6, %p1698_p5 }
 0x4b1   : > { %p1701_p8 = pnand %p1700_p7, %p1694_p2 }
 0x4b3   : > { %1704 = shalt.err (!%p1701_p8)
}
 0x4b4   : > { %s1826_s1 = smov 128   ;;  %s1827_s28 = smov 8  }
 0x4b5   : > { %1484 = dma.vmem_to_hbm [thread:$0]  (%p1954_p10), %s2205_s8, 1024, %s2210_s21, %s2214_s25, %s1826_s1, %s1826_s1, %s1827_s28  }
 0x4b6 PF: > { %s2337_s29 = sld [smem:[#allocation10_spill]]  ;;  %p1490_p9 = scmp.ge.s32.totalorder %s1819_s6, 2 }
 0x4b8   : > { %p1487_p11 = pnand %p1490_p9, %p1958_p12 }
 0x4bc   : > { %s1220_s30 = sand.u32 1, %s2337_s29  }
 0x4bd   : > { %s1221_s24 = scalar_lea.sflag [#allocation8], %s1220_s30 }
 0x4be   : > { %1762 = dma.done.wait (!%p1487_p11), %s1221_s24, 1024  }
 0x4bf   : > { %1764 = vsyncadd (!%p1487_p11), %s1221_s24, 4294966272  ;;  %s18_s6 = sadd.s32 1, %s1819_s6   ;;  %s2339_s23 = sld [smem:[#allocation20_spill]] }
 0x4c0   : > { %p2243_p13 = scmp.ge.s32.totalorder %s18_s6, 66   ;;  %s2340_s8 = sld [smem:[#allocation11_spill]] }
 0x4c1   : > { %s2341_s24 = sld [smem:[#allocation12_spill]]  ;;  %s2342_s25 = sld [smem:[#allocation13_spill]] }
 0x4c2   : > { %s2343_s26 = sld [smem:[#allocation14_spill]]  ;;  %s2344_s27 = sld [smem:[#allocation15_spill]] }
 0x4c3   : > { %s2345_s28 = sld [smem:[#allocation16_spill]]  ;;  %s2346_s29 = sld [smem:[#allocation17_spill]] }
 0x4c4   : > { %s2347_s30 = sld [smem:[#allocation19_spill]]  ;;  %s2348_s18 = smov %s1771_s19 }
 0x4c5   : > { %s2349_s19 = smov %s1775_s20  ;;  %s2350_s20 = smov %s1975_s14 }
 0x4c6   : > { %s2351_s21 = smov %s1783_s22  ;;  %s2352_s22 = smov %s2339_s23 }
 0x4c7   : > { %s2353_s23 = smov %s2340_s8  ;;  %17 = sbr.rel (!%p2243_p13) target bundleno = 15 (0xf), region = 144 }
 0x4ce   :  { %1226 = vsyncpa [#allocation8], 1 }
 0x4cf   :  { %1228 = vsyncpa [#allocation8 + $0x1], 1 }

</bundles_post_ra>
